<compile_context>
chip_gen: v5e
topology: v5e:2x2
jax: 0.10.0
libtpu: 0.0.40
codegen_flags: <defaults>
</compile_context>

<pallas_src>
import functools

import jax
import jax.numpy as jnp
from jax.experimental import pallas as pl
from jax.experimental.pallas import tpu as pltpu


def _round_up(x, m):
    return ((x + m - 1) // m) * m


def _proj_kernel(x_ref, w_ref, b_ref, o_ref):
    # x_ref: (TM, Kp)  streamed patch tile (double-buffered by the pipeline)
    # w_ref: (Kp, N)   pre-transposed projection weight, VMEM resident
    # b_ref: (1,  N)   bias, VMEM resident
    # o_ref: (TM, N)
    acc = jnp.dot(x_ref[...], w_ref[...], preferred_element_type=jnp.float32)
    o_ref[...] = (acc + b_ref[...]).astype(o_ref.dtype)


@functools.partial(jax.jit, static_argnames=("patch_size",))
def patch_embed_pallas(x, weight, bias, patch_size):
    """Pallas equivalent of PatchEmbed.forward.

    x:      (B, C, H, W)        float32, NCHW (matches the PyTorch module)
    weight: (embed_dim, C*p*p)  nn.Linear weight layout (out, in)
    bias:   (embed_dim,)
    returns (B, num_patches, embed_dim)
    """
    B, C, H, W = x.shape
    p = patch_size
    nH, nW = H // p, W // p
    num_patches = nH * nW

    # Parity with torch.unfold: silently drop any spatial remainder.
    if H != nH * p or W != nW * p:
        x = x[:, :, : nH * p, : nW * p]

    # Reproduce: unfold(2,p,p).unfold(3,p,p) -> view(B,C,-1,p,p)
    #            -> permute(0,2,1,3,4) -> reshape(B, num_patches, C*p*p)
    # Layout plumbing done in plain JAX; XLA materializes a single contiguous
    # (M, K) patches matrix which then streams efficiently through the Pallas
    # input DMA (no allow_input_fusion -> no 28-byte strided DMA descriptors).
    patches = x.reshape(B, C, nH, p, nW, p)
    patches = jnp.transpose(patches, (0, 2, 4, 1, 3, 5))    # (B, nH, nW, C, p, p)
    patches = patches.reshape(B * num_patches, C * p * p)   # (M, K)

    M, K = patches.shape
    N = weight.shape[0]

    # Pad contraction dim to a sublane-clean multiple of 8.  embed_dim N stays
    # un-padded: block last dim == full array dim is legal, output writes stay
    # lane-width 64 but total output bytes are halved vs padding to 128.
    Kp = _round_up(K, 8)

    # Tile M: target ~4 grid steps (so the "parallel" axis has work for both
    # v7x TensorCores) with tiles up to 2048 rows to amortize per-step
    # overhead.  Mp only pads up to the chosen tile, never a fixed large
    # multiple, so wasted rows are bounded by TM-1.
    Mp8 = _round_up(max(M, 8), 8)
    TM = min(2048, _round_up(pl.cdiv(Mp8, 4), 8))
    Mp = _round_up(Mp8, TM)

    patches_p = jnp.pad(patches, ((0, Mp - M), (0, Kp - K)))      # (Mp, Kp)
    # Pre-transpose once in the wrapper -> standard (K, N) MXU operand; the
    # pad+transpose fuse into the single small weight copy XLA already does.
    weight_t = jnp.pad(weight, ((0, 0), (0, Kp - K))).T           # (Kp, N)
    bias_r = bias.reshape(1, N)                                   # (1, N)

    grid = (Mp // TM,)

    out = pl.pallas_call(
        _proj_kernel,
        out_shape=jax.ShapeDtypeStruct((Mp, N), jnp.float32),
        grid=grid,
        in_specs=[
            pl.BlockSpec((TM, Kp), lambda i: (i, 0)),   # streamed patch tiles
            pl.BlockSpec((Kp, N), lambda i: (0, 0)),    # invariant -> fetched once
            pl.BlockSpec((1, N), lambda i: (0, 0)),     # invariant -> fetched once
        ],
        out_specs=pl.BlockSpec((TM, N), lambda i: (i, 0)),
        compiler_params=pltpu.CompilerParams(
            dimension_semantics=("parallel",),          # shard M tiles across TCs on v7x
            vmem_limit_bytes=32 * 1024 * 1024,          # safe on v5e, within v7x 64 MiB
        ),
    )(patches_p, weight_t, bias_r)

    return out[:M].reshape(B, num_patches, N)


def patch_embed_ref(x, weight, bias, patch_size):
    """Pure-JAX reference mirroring the PyTorch forward exactly."""
    B, C, H, W = x.shape
    p = patch_size
    nH, nW = H // p, W // p
    x = x[:, :, : nH * p, : nW * p]
    patches = x.reshape(B, C, nH, p, nW, p)
    patches = jnp.transpose(patches, (0, 2, 4, 1, 3, 5))
    patches = patches.reshape(B, nH * nW, C * p * p)
    return patches @ weight.T + bias


if __name__ == "__main__":
    # Module defaults: patch_size=7, embed_dim=64, img_size=28, in_chans=1
    patch_size, embed_dim, img_size, in_chans = 7, 64, 28, 1
    B = 2

    key = jax.random.PRNGKey(0)
    kx, kw, kb = jax.random.split(key, 3)

    x = jax.random.normal(kx, (B, in_chans, img_size, img_size), dtype=jnp.float32)

    in_features = patch_size * patch_size * in_chans
    # Deterministic parameter init (nn.Linear shapes: W=(out,in), b=(out,))
    bound = 1.0 / (in_features ** 0.5)
    weight = jax.random.uniform(kw, (embed_dim, in_features),
                                minval=-bound, maxval=bound, dtype=jnp.float32)
    bias = jax.random.uniform(kb, (embed_dim,),
                              minval=-bound, maxval=bound, dtype=jnp.float32)

    out = patch_embed_pallas(x, weight, bias, patch_size)
    out = jax.block_until_ready(out)
    ref = patch_embed_ref(x, weight, bias, patch_size)
    assert out.shape == (B, (img_size // patch_size) ** 2, embed_dim)
    assert jnp.allclose(out, ref, atol=1e-5, rtol=1e-5)

    # Multi-tile path: B=64 -> M = 1024 -> grid of 4 tiles of 256 rows.
    x_big = jax.random.normal(kx, (64, in_chans, img_size, img_size), dtype=jnp.float32)
    out_big = jax.block_until_ready(patch_embed_pallas(x_big, weight, bias, patch_size))
    ref_big = patch_embed_ref(x_big, weight, bias, patch_size)
    assert jnp.allclose(out_big, ref_big, atol=1e-5, rtol=1e-5)

    # Awkward M (padded tail tile gets sliced off): B=5 -> M = 80.
    x_odd = jax.random.normal(kb, (5, in_chans, img_size, img_size), dtype=jnp.float32)
    out_odd = jax.block_until_ready(patch_embed_pallas(x_odd, weight, bias, patch_size))
    ref_odd = patch_embed_ref(x_odd, weight, bias, patch_size)
    assert jnp.allclose(out_odd, ref_odd, atol=1e-5, rtol=1e-5)

    print("KERNEL_OK")
</pallas_src>

<mosaic_0001>
module attributes {stable_mosaic.version = 11 : i64} {
  func.func @_proj_kernel(%arg0: i32, %arg1: memref<8x56xf32, #tpu.memory_space<vmem>>, %arg2: memref<56x64xf32, #tpu.memory_space<vmem>>, %arg3: memref<1x64xf32, #tpu.memory_space<vmem>>, %arg4: memref<8x64xf32, #tpu.memory_space<vmem>>) attributes {dimension_semantics = [#tpu.dimension_semantics<parallel>], iteration_bounds = array<i64: 4>, scalar_prefetch = 0 : i64, scratch_operands = 0 : i64, tpu.core_type = #tpu.core_type<tc>, window_params = [{transform_indices = @transform_0, window_bounds = array<i64: 8, 56>}, {pipeline_mode = #tpu.pipeline_mode<synchronous>, transform_indices = @transform_1, window_bounds = array<i64: 56, 64>}, {pipeline_mode = #tpu.pipeline_mode<synchronous>, transform_indices = @transform_2, window_bounds = array<i64: 1, 64>}, {transform_indices = @transform_3, window_bounds = array<i64: 8, 64>}]} {
    %c0 = arith.constant 0 : index
    %c0_0 = arith.constant 0 : index
    %0 = vector.load %arg1[%c0, %c0_0] : memref<8x56xf32, #tpu.memory_space<vmem>>, vector<8x56xf32>
    %c0_1 = arith.constant 0 : index
    %c0_2 = arith.constant 0 : index
    %1 = vector.load %arg2[%c0_1, %c0_2] : memref<56x64xf32, #tpu.memory_space<vmem>>, vector<56x64xf32>
    %cst = arith.constant dense<0.000000e+00> : vector<8x64xf32>
    %2 = tpu.matmul %0, %1, %cst {dimension_numbers = #tpu.dot_dimension_numbers<[1], [0], [0], [1], [0, 0, 1, 1], [], []>} : vector<8x56xf32>, vector<56x64xf32>, vector<8x64xf32> -> vector<8x64xf32>
    %c0_3 = arith.constant 0 : index
    %c0_4 = arith.constant 0 : index
    %3 = vector.load %arg3[%c0_3, %c0_4] : memref<1x64xf32, #tpu.memory_space<vmem>>, vector<1x64xf32>
    %4 = vector.broadcast %3 : vector<1x64xf32> to vector<8x64xf32>
    %5 = arith.addf %2, %4 : vector<8x64xf32>
    %c0_5 = arith.constant 0 : index
    %c0_6 = arith.constant 0 : index
    %6 = vector.load %arg4[%c0_5, %c0_6] : memref<8x64xf32, #tpu.memory_space<vmem>>, vector<8x64xf32>
    tpu.vector_store %arg4[%c0_5, %c0_6], %5 {strides = array<i32>} : memref<8x64xf32, #tpu.memory_space<vmem>>, vector<8x64xf32>,
    return
  }
  func.func @transform_0(%arg0: i32) -> (i32, i32) {
    %c0_i32 = arith.constant 0 : i32
    %c0_i32_0 = arith.constant 0 : i32
    return %arg0, %c0_i32 : i32, i32
  }
  func.func @transform_1(%arg0: i32) -> (i32, i32) {
    %c0_i32 = arith.constant 0 : i32
    %c0_i32_0 = arith.constant 0 : i32
    %c0_i32_1 = arith.constant 0 : i32
    return %c0_i32, %c0_i32_0 : i32, i32
  }
  func.func @transform_2(%arg0: i32) -> (i32, i32) {
    %c0_i32 = arith.constant 0 : i32
    %c0_i32_0 = arith.constant 0 : i32
    %c0_i32_1 = arith.constant 0 : i32
    return %c0_i32, %c0_i32_0 : i32, i32
  }
  func.func @transform_3(%arg0: i32) -> (i32, i32) {
    %c0_i32 = arith.constant 0 : i32
    %c0_i32_0 = arith.constant 0 : i32
    return %arg0, %c0_i32 : i32, i32
  }
}

</mosaic_0001>

<bundles_post_ra>
// kernel: patch_embed_pallas.1
= control target key start
LH: loop header
LB: loop body
LE: loop exit
PB: predicated region body
PF: predicated region fallthrough
CT: control target
= control target key end

     0   :  { %8 = vsyncpa [#allocation3], 0  ;;  %s523_s0 = inlined_call_operand.vmem [shape: f32[32,56], index: 0, kind: input, shape index: {}]   ;;  %s524_s1 = inlined_call_operand.vmem [shape: f32[56,64], index: 1, kind: input, shape index: {}]   ;;  %s525_s2 = inlined_call_operand.vmem [shape: f32[1,64], index: 2, kind: input, shape index: {}]   ;;  %s526_s3 = inlined_call_operand.hbm [shape: f32[32,64], index: 3, kind: output, shape index: {}]  }
   0x1   :  { %10 = vsyncpa [#allocation3 + $0x1], 0  ;;  %s414_s12 = smov 0   ;;  %s416_s13 = smov 0  }
   0x2   :  { %s418_s14 = smov 0   ;;  %s420_s15 = smov 0  }
   0x3 LB: > { %s435_s16 = sadd.s32 4294967295, %s392_s15   ;;  %s279_s17 = sadd.s32 4294967294, %s392_s15   ;;  %s392_s15 = sphi %s420_s15, %s532_s15   ;;  %s388_s14 = sphi %s418_s14, %s531_s14   ;;  %s384_s13 = sphi %s416_s13, %s530_s13   ;;  %s380_s12 = sphi %s414_s12, %s529_s12  }
   0x4   : > { %s439_s18 = sadd.s32 1, %s392_s15   ;;  %s91_s19 = sadd.s32 1, %s388_s14 }
   0x5   : > { %s88_s20 = ssub.s32 %s392_s15, %s439_s18  ;;  %p101_p0 = scmp.ne.s32.totalorder %s388_s14, %s384_s13 }
   0x6   : > { %p89_p1 = scmp.eq.s32.totalorder %s88_s20, 0  ;;  %p102_p2 = scmp.eq.s32.totalorder %s435_s16, 3 }
   0x7   : > { %p107_p3 = scmp.ne.s32.totalorder %s384_s13, %s380_s12  ;;  %p108_p4 = scmp.eq.s32.totalorder %s279_s17, 3 }
   0x8   : > { %s450_s21 = scalar_select %p89_p1, %s388_s14, %s91_s19  }
   0x9   : > { %p452_p5 = por %p102_p2, %p101_p0  ;;  %p456_p6 = por %p108_p4, %p107_p3 }
   0xa   : > { %p282_p7 = scmp.ge.s32.totalorder %s392_s15, 1  ;;  %p139_p8 = scmp.lt.s32.totalorder %s392_s15, 5 }
   0xc   : > { %p140_p9 = pnand %p282_p7, %p139_p8 }
   0xd   : > { %p162_p10 = scmp.lt.s32.totalorder (!%p140_p9), %s435_s16, 3  ;;  %s159_s25 = sand.u32 (!%p140_p9), 1, %s384_s13  }
   0xe   : > { %143 = sbr.rel (%p140_p9) target bundleno = 164 (0xa4), region = 32  ;;  %s283_s26 = sshll.u32 (!%p140_p9), %s159_s25, 3 }
   0xf   : > { %s287_s27 = sshll.u32 (!%p140_p9), %s435_s16, 3  ;;  %s205_s9 = scalar_lea.sflag (!%p140_p9), [#allocation3], %s159_s25 }
  0x13   : > { %v173_v0 = vld [vmem:[%s524_s1 + $0x30] sm:$0xff]  ;;  %v172_v1 = vld [vmem:[%s524_s1 + $0x28] sm:$0xff]  ;;  %v171_v2 = vld [vmem:[%s524_s1 + $0x20] sm:$0xff]  ;;  %s163_s30 = scalar_select %p162_p10, %s435_s16, 3  ;;  %vm178_vm0 = vcmask 457728   ;;  %vm202_vm1 = vcmask 523264  }
  0x14   : > { %191 = vmatpush.msra.mxu0 %v173_v0  ;;  %v170_v3 = vld [vmem:[%s524_s1 + $0x18] sm:$0xff]  ;;  %v169_v4 = vld [vmem:[%s524_s1 + $0x10] sm:$0xff]  ;;  %v168_v5 = vld [vmem:[%s524_s1 + $0x8] sm:$0xff] }
  0x15   : > { %s284_s6 = sshll.u32 %s163_s30, 3  ;;  %v167_v6 = vld [vmem:[%s524_s1] sm:$0xff]  ;;  %s215_s30 = scalar_lea.hbm %s526_s3, %s287_s27 }
  0x16   : > { %192 = vmatpush.msra.mxu0 %v172_v1  ;;  %s165_s19 = scalar_lea.vmem %s523_s0, %s284_s6  ;;  %v329_v8 = vld [vmem:[%s525_s2] ss:$0 sm:$0xff]  ;;  %s161_s6 = scalar_lea.vmem [#allocation2], %s283_s26 }
  0x17   : > { %v166_v7 = vld [vmem:[%s165_s19] sm:$0xff]  ;;  %s217_s7 = sshll.u32 %s161_s6, 4  ;;  %s219_s8 = sshll.u32 %s215_s30, 4  ;;  %s218_s7 = int_to_ptr.vmem [resolvable:$true] %s217_s7  ;;  %s220_s8 = int_to_ptr.hbm [resolvable:$true] %s219_s8 }
  0x18   : > { %193 = vmatpush.msra.mxu0 %v171_v2  ;;  %s344_s16 = sshra.s32 %s220_s8, 4  ;;  %s350_s19 = scalar_lea.hbm %s526_s3, 32  ;;  %s345_s16 = int_to_ptr.hbm [resolvable:$true] %s344_s16 }
  0x19   : > { %s346_s10 = scalar_lea.hbm %s345_s16, 8  ;;  %p351_p0 = scmp.lt.s32.totalorder %s345_s16, %s526_s3 }
  0x1a   : > { %194 = vmatpush.msra.mxu0 %v170_v3  ;;  %p347_p11 = scmp.ne.s32.totalorder %s345_s16, %s346_s10  ;;  %p352_p1 = scmp.lt.s32.totalorder %s350_s19, %s346_s10 }
  0x1c   : > { %195 = vmatpush.msra.mxu0 %v169_v4  ;;  %p348_p12 = pnand %p347_p11, %p452_p5  ;;  %p353_p2 = por %p352_p1, %p351_p0 }
  0x1e   : > { %196 = vmatpush.msra.mxu0 %v168_v5  ;;  %p349_p13 = pneg %p348_p12 }
  0x20   : > { %197 = vmatpush.msra.mxu0 %v167_v6  ;;  %p354_p3 = pnand %p353_p2, %p349_p13 }
  0x21   : > { %285 = vmatmul.msk.f32.vlgmr.msra.gmra.mxu0 %vm178_vm0, %v166_v7 }
  0x9e   : > { %v199_v9 = vpop.f32.mrf.mxu0 }
  0x9f   : > { %v200_v10 = vadd.f32 %v329_v8, %v199_v9 }
  0xa1   : > { %203 = vst.msk [vmem:[%s161_s6] sm:$0xff] %vm202_vm1, %v200_v10 }
  0xa2   : > { %357 = shalt.err (!%p354_p3)
}
  0xa3   : > { %290 = dma.vmem_to_hbm [thread:$0]  (%p452_p5), %s218_s7, 128, %s220_s8, %s205_s9  }
  0xa4 PF: > { %p296_p4 = scmp.ge.s32.totalorder %s392_s15, 2  ;;  %s231_s25 = sand.u32 1, %s380_s12  }
  0xa5   : > { %s232_s26 = scalar_lea.sflag [#allocation3], %s231_s25 }
  0xa6   : > { %p293_p7 = pnand %p296_p4, %p456_p6 }
  0xa8   : > { %p294_p8 = pneg %p293_p7 }
  0xaa   : > { %375 = dma.done.wait (%p294_p8), %s232_s26, 128  }
  0xab   : > { %377 = vsyncadd (%p294_p8), %s232_s26, 4294967168  ;;  %p13_p9 = scmp.ge.s32.totalorder %s439_s18, 6   ;;  %s529_s12 = smov %s384_s13 }
  0xac   : > { %s530_s13 = smov %s388_s14  ;;  %s531_s14 = smov %s450_s21 }
  0xad   : > { %s532_s15 = smov %s439_s18  ;;  %15 = sbr.rel (!%p13_p9) target bundleno = 3 (0x3), region = 67 }
  0xb2   :  { %238 = vsyncpa [#allocation3], 1 }
  0xb3   :  { %240 = vsyncpa [#allocation3 + $0x1], 1 }

</bundles_post_ra>
